<compile_context>
chip_gen: v7x
topology: tpu7x:2x2x1
jax: 0.10.0
libtpu: 0.0.40
codegen_flags: <defaults>
</compile_context>

<pallas_src>
import functools
import math

import jax
import jax.numpy as jnp
from jax import lax
from jax.experimental import pallas as pl
from jax.experimental.pallas import tpu as pltpu


_CHUNK = 128            # lane width of one vreg column chunk
_TILE_MAX = 8192        # max columns per grid step (<= 64 unrolled chunks)
_BLOCK_MAX = 4 << 20    # cap on one (rows, cols) input block, bytes
_STEP_TARGET = 1 << 20  # aim to move ~1 MiB of input per grid step


def _acc_dtype(x_dtype):
    """Accumulation dtype. bf16/f16 stay native on v6e/v7x (min/max is exact
    and it halves vreg + on-chip bytes); older chips (<= v5, no 16-bit VALU)
    and all other dtypes use float32."""
    dt = jnp.dtype(x_dtype)
    if dt in (jnp.dtype(jnp.bfloat16), jnp.dtype(jnp.float16)):
        kind = ""
        try:
            kind = jax.devices()[0].device_kind.lower()
        except Exception:
            pass
        if any(tag in kind for tag in ("v2", "v3", "v4", "v5")):
            return jnp.dtype(jnp.float32)
        return dt
    return jnp.dtype(jnp.float32)


def _choose_blocks(R, post, itemsize):
    """Pick (row_block, column_tile, use_chunk_loop) for the (R, post) view."""
    # Row block small enough that the (rb, 128) vreg carries of the chunk loop
    # fit in <= 8 vregs (no spills).
    rb = R
    for cand in (32, 16, 8):
        if R % cand == 0:
            rb = cand
            break

    # Column tile: as wide as possible (lane-dense, few grid steps).
    tile = post if post <= _TILE_MAX else _TILE_MAX
    if rb * tile * itemsize > _BLOCK_MAX:          # only when rb == R and R huge
        t = max(_CHUNK, (_BLOCK_MAX // (rb * itemsize) // _CHUNK) * _CHUNK)
        tile = min(tile, t)

    chunked = (tile % _CHUNK == 0) and (rb <= 32)

    # Small-column shapes: grow the row block (switching to a per-step jnp
    # reduce, no vreg carries) so each grid step still moves ~1 MiB.
    if rb <= 32 and R > rb and rb * tile * itemsize < (_STEP_TARGET // 2):
        cap = min(R, 512, max(rb, _STEP_TARGET // max(tile * itemsize, 1)))
        best = rb
        c = (cap // 8) * 8
        while c > best:
            if R % c == 0:
                best = c
                break
            c -= 8
        rb = best
        chunked = (tile % _CHUNK == 0) and (rb <= 32)

    return rb, tile, chunked


def _make_minmax_kernel(rb, tile, post, n_tiles, acc_dtype, chunked):
    n_chunks = tile // _CHUNK if chunked else 0
    pos = float(jnp.finfo(acc_dtype).max)
    neg = float(jnp.finfo(acc_dtype).min)
    ragged = (post % tile) != 0        # implies n_tiles >= 2 (tile <= post)

    def _step_minmax(x_ref):
        """Step-local min/max of the (rb, tile) block, carried in vregs."""
        if chunked:
            x0 = x_ref[:, pl.ds(0, _CHUNK)].astype(acc_dtype)
            mn, mx = x0, x0
            # Statically unrolled 128-lane chunk loop: only two (rb, 128)
            # carries stay live -> no wide VMEM accumulator RMW per element.
            for c in range(1, n_chunks):
                xc = x_ref[:, pl.ds(c * _CHUNK, _CHUNK)].astype(acc_dtype)
                mn = jnp.minimum(mn, xc)
                mx = jnp.maximum(mx, xc)
            return mn, mx                                   # (rb, 128)
        x = x_ref[...].astype(acc_dtype)
        return (jnp.min(x, axis=1, keepdims=True),
                jnp.max(x, axis=1, keepdims=True))          # (rb, 1)

    def kernel(x_ref, mn_ref, mx_ref):
        t = pl.program_id(1)

        def _combine(mn_s, mx_s):
            @pl.when(t == 0)
            def _():
                mn_ref[...] = jnp.broadcast_to(mn_s, mn_ref.shape)
                mx_ref[...] = jnp.broadcast_to(mx_s, mx_ref.shape)

            @pl.when(t > 0)
            def _():
                mn_ref[...] = jnp.minimum(mn_ref[...], mn_s)
                mx_ref[...] = jnp.maximum(mx_ref[...], mx_s)

        if not ragged:
            mn_s, mx_s = _step_minmax(x_ref)
            _combine(mn_s, mx_s)
        else:
            # Only the last column tile is partial: mask there and nowhere
            # else so the hot steps stay pure min/max.
            @pl.when(t < n_tiles - 1)
            def _():
                mn_s, mx_s = _step_minmax(x_ref)
                _combine(mn_s, mx_s)

            @pl.when(t == n_tiles - 1)
            def _():
                x = x_ref[...].astype(acc_dtype)
                col = t * tile + lax.broadcasted_iota(jnp.int32, x.shape, 1)
                valid = col < post
                mn_s = jnp.min(jnp.where(valid, x, pos), axis=1, keepdims=True)
                mx_s = jnp.max(jnp.where(valid, x, neg), axis=1, keepdims=True)
                mn_ref[...] = jnp.minimum(mn_ref[...], mn_s)
                mx_ref[...] = jnp.maximum(mx_ref[...], mx_s)

    return kernel


def _row_min_max(x2d, acc_dtype):
    """Per-row min and max (as float32) of a 2-D (R, post) array via Pallas."""
    R, post = int(x2d.shape[0]), int(x2d.shape[1])
    itemsize = jnp.dtype(x2d.dtype).itemsize
    rb, tile, chunked = _choose_blocks(R, post, itemsize)
    n_tiles = pl.cdiv(post, tile)
    kernel = _make_minmax_kernel(rb, tile, post, n_tiles, acc_dtype, chunked)

    # Lane-dense (R, 128) partial outputs stay resident in VMEM across the
    # column axis (same block index -> accumulator) and are written back once;
    # the cheap final cross-lane reduce happens in plain (jitted) JAX.
    mn_p, mx_p = pl.pallas_call(
        kernel,
        out_shape=(jax.ShapeDtypeStruct((R, _CHUNK), acc_dtype),
                   jax.ShapeDtypeStruct((R, _CHUNK), acc_dtype)),
        grid_spec=pltpu.PrefetchScalarGridSpec(
            num_scalar_prefetch=0,
            grid=(R // rb, n_tiles),
            in_specs=[pl.BlockSpec((rb, tile), lambda r, t: (r, t))],
            out_specs=[pl.BlockSpec((rb, _CHUNK), lambda r, t: (r, 0)),
                       pl.BlockSpec((rb, _CHUNK), lambda r, t: (r, 0))]),
        compiler_params=pltpu.CompilerParams(
            # TODO(synk): on v7x a real 2-TC split (CORE_PARALLEL / core_map on
            # the row axis) would be worth up to ~2x for HBM-bound shapes.
            dimension_semantics=("parallel", "arbitrary"),
            vmem_limit_bytes=32 << 20),   # <= half of v7x's 64 MiB core VMEM
    )(x2d)
    return (jnp.min(mn_p.astype(jnp.float32), axis=1),
            jnp.max(mx_p.astype(jnp.float32), axis=1))


def _tensor_min_max(x, acc_dtype):
    """Global min/max (scalars) of a tensor via the row-min/max kernel."""
    size = int(x.size)
    flat = x.reshape(-1)
    # Prefer a free, sublane-dense fold of the whole tensor.
    for r in (32, 16, 8):
        if size % r == 0 and size // r >= _CHUNK:
            mins, maxs = _row_min_max(flat.reshape(r, size // r), acc_dtype)
            return jnp.min(mins), jnp.max(maxs)
    # Odd-sized tensor: kernel on the largest (8, k*128) prefix, tiny tail
    # reduced in plain jnp and combined (keeps all 8 sublanes busy).
    unit = 8 * _CHUNK
    main = (size // unit) * unit
    if main == 0:
        # TODO(synk): tensors smaller than 1024 elements skip the Pallas path.
        xf = flat.astype(jnp.float32)
        return jnp.min(xf), jnp.max(xf)
    mins, maxs = _row_min_max(flat[:main].reshape(8, main // 8), acc_dtype)
    mn, mx = jnp.min(mins), jnp.max(maxs)
    if main < size:
        tail = flat[main:].astype(jnp.float32)
        mn = jnp.minimum(mn, jnp.min(tail))
        mx = jnp.maximum(mx, jnp.max(tail))
    return mn, mx


def _calc_min_max_value(x, symmetric, ch_axis):
    """min_val / max_val exactly as the PyTorch Observer.calc_min_max_value."""
    x = jnp.asarray(x)
    acc_dtype = _acc_dtype(x.dtype)

    if ch_axis == -1:
        mn, mx = _tensor_min_max(x, acc_dtype)
        if symmetric:
            mx = jnp.maximum(jnp.abs(mn), jnp.abs(mx))
            mn = -mx
        return mn, mx

    k = ch_axis % x.ndim
    dims = x.shape
    pre = int(math.prod(dims[:k])) if k > 0 else 1
    C = int(dims[k])
    post = int(math.prod(dims[k + 1:])) if k + 1 < x.ndim else 1
    # Free reshape: fold the leading axes into the row dim so small-C
    # activations still fill all 8 sublanes; combine over `pre` afterwards.
    x2d = x.reshape(pre * C, post)
    mins, maxs = _row_min_max(x2d, acc_dtype)              # (pre*C,)
    mn = jnp.min(mins.reshape(pre, C), axis=0)
    mx = jnp.max(maxs.reshape(pre, C), axis=0)
    if symmetric:
        mx = jnp.maximum(jnp.abs(mn), jnp.abs(mx))
        mn = -mx
    return mn, mx


# ---------------------------------------------------------------------------
# Observer (stateful wrapper, mirrors the PyTorch module semantics)
# ---------------------------------------------------------------------------
class EmaMinMaxObserver:
    def __init__(self, symmetric=True, ch_axis=-1, ema_ratio=0.9):
        if symmetric:
            self.quant_min, self.quant_max = (-127, 127)
        else:
            self.quant_min, self.quant_max = (0, 255)
        self.symmetric = symmetric
        self.ch_axis = ch_axis
        self.ema_ratio = ema_ratio
        # TODO(synk): EMA state in Python attributes mirrors the nn.Module but
        # is not jit/scan-safe inside a compiled training loop.
        self.min_val = None
        self.max_val = None
        # Whole min/max pipeline (kernel + reshapes + combines) in one jit.
        self._minmax = jax.jit(functools.partial(
            _calc_min_max_value, symmetric=symmetric, ch_axis=ch_axis))

    def calc_qparams(self):
        max_val = jnp.maximum(self.max_val, jnp.zeros_like(self.max_val))
        min_val = jnp.minimum(self.min_val, jnp.zeros_like(self.min_val))
        scale = (max_val - min_val) / (self.quant_max - self.quant_min)
        if self.symmetric:
            zero_point = jnp.zeros_like(scale).astype(jnp.int32)
        else:
            # Guard the division for a degenerate (constant-zero) tensor so
            # zero_point stays finite; scale keeps the spec's value.
            safe_scale = jnp.where(scale > 0, scale, jnp.ones_like(scale))
            zero_point = jnp.clip(
                jnp.round(self.quant_min - self.min_val / safe_scale),
                self.quant_min, self.quant_max).astype(jnp.int32)
        return scale, zero_point

    def __call__(self, x):
        min_val, max_val = self._minmax(x)
        if self.min_val is None:
            self.min_val = min_val
            self.max_val = max_val
        else:
            self.min_val = (self.min_val * self.ema_ratio
                            + min_val * (1.0 - self.ema_ratio))
            self.max_val = (self.max_val * self.ema_ratio
                            + max_val * (1.0 - self.ema_ratio))
        return self.calc_qparams()


# ---------------------------------------------------------------------------
# Pure-JAX reference (lightweight correctness check)
# ---------------------------------------------------------------------------
def _ref_minmax(x, symmetric, ch_axis):
    if ch_axis == -1:
        if symmetric:
            mx = jnp.max(jnp.abs(x))
            return -mx, mx
        return jnp.min(x), jnp.max(x)
    x2d = jnp.moveaxis(x, ch_axis, 0).reshape(x.shape[ch_axis], -1)
    if symmetric:
        mx = jnp.max(jnp.abs(x2d), axis=1)
        return -mx, mx
    return jnp.min(x2d, axis=1), jnp.max(x2d, axis=1)


if __name__ == "__main__":
    key = jax.random.PRNGKey(0)
    k1, k2, k3, k4 = jax.random.split(key, 4)
    # Layout: NCHW, as in the PyTorch module.
    x1 = jax.random.normal(k1, (2, 4, 16, 16), dtype=jnp.float32) * 3.0
    x2 = jax.random.normal(k2, (2, 4, 16, 16), dtype=jnp.float32) * 2.0 + 0.5

    # --- symmetric, per-tensor (ch_axis=-1), two calls (EMA update) ---
    obs_sym = EmaMinMaxObserver(symmetric=True, ch_axis=-1, ema_ratio=0.9)
    s1, zp1 = obs_sym(x1)
    s1b, zp1b = obs_sym(x2)
    jax.block_until_ready((s1, zp1, s1b, zp1b))

    mn_r, mx_r = _ref_minmax(x1, True, -1)
    mn2, mx2 = _ref_minmax(x2, True, -1)
    mn_e = mn_r * 0.9 + mn2 * 0.1
    mx_e = mx_r * 0.9 + mx2 * 0.1
    s_ref = (jnp.maximum(mx_e, 0.0) - jnp.minimum(mn_e, 0.0)) / 254.0
    assert jnp.allclose(s1b, s_ref, rtol=1e-6, atol=1e-6)
    assert int(zp1b) == 0 and zp1b.dtype == jnp.int32

    # --- asymmetric, per-channel (ch_axis=1 in NCHW), two calls ---
    obs_asym = EmaMinMaxObserver(symmetric=False, ch_axis=1, ema_ratio=0.9)
    s2, zp2 = obs_asym(x1)
    s2b, zp2b = obs_asym(x2)
    jax.block_until_ready((s2b, zp2b))
    mn_r, mx_r = _ref_minmax(x1, False, 1)
    mn2, mx2 = _ref_minmax(x2, False, 1)
    mn_e = mn_r * 0.9 + mn2 * 0.1
    mx_e = mx_r * 0.9 + mx2 * 0.1
    s_ref = (jnp.maximum(mx_e, 0.0) - jnp.minimum(mn_e, 0.0)) / 255.0
    zp_ref = jnp.clip(jnp.round(0.0 - mn_e / s_ref), 0, 255).astype(jnp.int32)
    assert s2b.shape == (4,) and zp2b.shape == (4,)
    assert jnp.allclose(s2b, s_ref, rtol=1e-6, atol=1e-6)
    assert jnp.array_equal(zp2b, zp_ref)

    # --- bf16 input path (native-dtype accumulation on v6e/v7x, f32 on v5) ---
    obs_bf16 = EmaMinMaxObserver(symmetric=True, ch_axis=1, ema_ratio=0.9)
    s3, zp3 = obs_bf16(x1.astype(jnp.bfloat16))
    jax.block_until_ready((s3, zp3))
    mn_b, mx_b = _ref_minmax(x1.astype(jnp.bfloat16).astype(jnp.float32), True, 1)
    s3_ref = (jnp.maximum(mx_b, 0.0) - jnp.minimum(mn_b, 0.0)) / 254.0
    assert jnp.allclose(s3, s3_ref, rtol=1e-6, atol=1e-6)

    # --- per-tensor, multi-tile + ragged last tile (masked last step) ---
    x3 = jax.random.normal(k3, (8, 8, 64, 66), dtype=jnp.float32) * 1.7
    obs_big = EmaMinMaxObserver(symmetric=True, ch_axis=-1, ema_ratio=0.9)
    s4, zp4 = obs_big(x3)
    jax.block_until_ready((s4, zp4))
    mx4 = jnp.max(jnp.abs(x3))
    assert jnp.allclose(s4, 2.0 * mx4 / 254.0, rtol=1e-6, atol=1e-6)

    # --- per-channel with larger C (grown row block / per-step reduce path) ---
    x4 = jax.random.normal(k4, (2, 64, 16, 16), dtype=jnp.float32) + 0.3
    obs_c = EmaMinMaxObserver(symmetric=False, ch_axis=1, ema_ratio=0.9)
    s5, zp5 = obs_c(x4)
    jax.block_until_ready((s5, zp5))
    mn5, mx5 = _ref_minmax(x4, False, 1)
    s5_ref = (jnp.maximum(mx5, 0.0) - jnp.minimum(mn5, 0.0)) / 255.0
    assert s5.shape == (64,)
    assert jnp.allclose(s5, s5_ref, rtol=1e-6, atol=1e-6)

    print("KERNEL_OK")
</pallas_src>

<mosaic_0001>
module attributes {stable_mosaic.version = 11 : i64} {
  func.func @kernel(%arg0: i32, %arg1: i32, %arg2: memref<16x128xf32, #tpu.memory_space<vmem>>, %arg3: memref<16x128xf32, #tpu.memory_space<vmem>>, %arg4: memref<16x128xf32, #tpu.memory_space<vmem>>) attributes {dimension_semantics = [#tpu.dimension_semantics<parallel>, #tpu.dimension_semantics<arbitrary>], iteration_bounds = array<i64: 1, 1>, scalar_prefetch = 0 : i64, scratch_operands = 0 : i64, tpu.core_type = #tpu.core_type<tc>, window_params = [{transform_indices = @transform_0, window_bounds = array<i64: 16, 128>}, {transform_indices = @transform_1, window_bounds = array<i64: 16, 128>}, {transform_indices = @transform_2, window_bounds = array<i64: 16, 128>}]} {
    %c0 = arith.constant 0 : index
    %c0_0 = arith.constant 0 : index
    %0 = vector.load %arg2[%c0, %c0_0] : memref<16x128xf32, #tpu.memory_space<vmem>>, vector<16x128xf32>
    %c0_i32 = arith.constant 0 : i32
    %1 = arith.cmpi eq, %arg1, %c0_i32 : i32
    %2 = arith.extui %1 : i1 to i32
    %c0_i32_1 = arith.constant 0 : i32
    %3 = arith.cmpi ne, %2, %c0_i32_1 : i32
    scf.if %3 {
      %c0_4 = arith.constant 0 : index
      %c0_5 = arith.constant 0 : index
      %7 = vector.load %arg3[%c0_4, %c0_5] : memref<16x128xf32, #tpu.memory_space<vmem>>, vector<16x128xf32>
      tpu.vector_store %arg3[%c0_4, %c0_5], %0 {strides = array<i32>} : memref<16x128xf32, #tpu.memory_space<vmem>>, vector<16x128xf32>,
      %c0_6 = arith.constant 0 : index
      %c0_7 = arith.constant 0 : index
      %8 = vector.load %arg4[%c0_6, %c0_7] : memref<16x128xf32, #tpu.memory_space<vmem>>, vector<16x128xf32>
      tpu.vector_store %arg4[%c0_6, %c0_7], %0 {strides = array<i32>} : memref<16x128xf32, #tpu.memory_space<vmem>>, vector<16x128xf32>,
    } else {
    }
    %c0_i32_2 = arith.constant 0 : i32
    %4 = arith.cmpi sgt, %arg1, %c0_i32_2 : i32
    %5 = arith.extui %4 : i1 to i32
    %c0_i32_3 = arith.constant 0 : i32
    %6 = arith.cmpi ne, %5, %c0_i32_3 : i32
    scf.if %6 {
      %c0_4 = arith.constant 0 : index
      %c0_5 = arith.constant 0 : index
      %7 = vector.load %arg3[%c0_4, %c0_5] : memref<16x128xf32, #tpu.memory_space<vmem>>, vector<16x128xf32>
      %8 = arith.minimumf %7, %0 : vector<16x128xf32>
      %c0_6 = arith.constant 0 : index
      %c0_7 = arith.constant 0 : index
      %9 = vector.load %arg3[%c0_6, %c0_7] : memref<16x128xf32, #tpu.memory_space<vmem>>, vector<16x128xf32>
      tpu.vector_store %arg3[%c0_6, %c0_7], %8 {strides = array<i32>} : memref<16x128xf32, #tpu.memory_space<vmem>>, vector<16x128xf32>,
      %c0_8 = arith.constant 0 : index
      %c0_9 = arith.constant 0 : index
      %10 = vector.load %arg4[%c0_8, %c0_9] : memref<16x128xf32, #tpu.memory_space<vmem>>, vector<16x128xf32>
      %11 = arith.maximumf %10, %0 : vector<16x128xf32>
      %c0_10 = arith.constant 0 : index
      %c0_11 = arith.constant 0 : index
      %12 = vector.load %arg4[%c0_10, %c0_11] : memref<16x128xf32, #tpu.memory_space<vmem>>, vector<16x128xf32>
      tpu.vector_store %arg4[%c0_10, %c0_11], %11 {strides = array<i32>} : memref<16x128xf32, #tpu.memory_space<vmem>>, vector<16x128xf32>,
    } else {
    }
    return
  }
  func.func @transform_0(%arg0: i32, %arg1: i32) -> (i32, i32) {
    %c0_i32 = arith.constant 0 : i32
    return %arg0, %arg1 : i32, i32
  }
  func.func @transform_1(%arg0: i32, %arg1: i32) -> (i32, i32) {
    %c0_i32 = arith.constant 0 : i32
    %c0_i32_0 = arith.constant 0 : i32
    return %arg0, %c0_i32 : i32, i32
  }
  func.func @transform_2(%arg0: i32, %arg1: i32) -> (i32, i32) {
    %c0_i32 = arith.constant 0 : i32
    %c0_i32_0 = arith.constant 0 : i32
    return %arg0, %c0_i32 : i32, i32
  }
}

</mosaic_0001>

<bundles_post_ra>
// kernel: _calc_min_max_value.1
= control target key start
LH: loop header
LB: loop body
LE: loop exit
PB: predicated region body
PF: predicated region fallthrough
CT: control target
= control target key end

     0   :  { %s77_s0 = inlined_call_operand.vmem [shape: f32[16,128], index: 0, kind: input, shape index: {}]   ;;  %s78_s1 = inlined_call_operand.vmem [shape: f32[16,128], index: 1, kind: output, shape index: {0}]   ;;  %s79_s2 = inlined_call_operand.vmem [shape: f32[16,128], index: 2, kind: output, shape index: {1}]  }
   0x1   :  { %v10_v0 = vld [vmem:[%s77_s0] sm:$0xff]  ;;  %v11_v1 = vld [vmem:[%s77_s0 + $0x8] sm:$0xff] }
   0x2   :  { %16 = vst [vmem:[%s78_s1] sm:$0xff] %v10_v0  ;;  %17 = vst [vmem:[%s78_s1 + $0x8] sm:$0xff] %v11_v1 }
   0x3   :  { %18 = vst [vmem:[%s79_s2] sm:$0xff] %v10_v0  ;;  %19 = vst [vmem:[%s79_s2 + $0x8] sm:$0xff] %v11_v1 }

</bundles_post_ra>
